<compile_context>
chip_gen: v6e
topology: v6e:2x2x1
jax: 0.10.0
libtpu: 0.0.40
codegen_flags: <defaults>
</compile_context>

<pallas_src>
import jax
import jax.numpy as jnp
from jax.experimental import pallas as pl
from jax.experimental.pallas import tpu as pltpu

STATE_SIZE = 7        # env.observation_space.shape[0]
ACTION_SIZE = 4       # env.action_space.n (Discrete(4))
HIDDEN = (64, 64, 64, 24, 24)
LAYER_SIZES = (STATE_SIZE,) + HIDDEN + (ACTION_SIZE,)
NUM_LAYERS = len(LAYER_SIZES) - 1   # 6

IN_PAD = 8            # state_size 7 padded to 8 lanes (last block dim == full dim)
OUT_PAD = 8           # action_size 4 padded to 8 lanes
FEAT = 64             # padded feature width for hidden layers / param slabs


def _round_up(x, m):
    return (x + m - 1) // m * m


def dqn_kernel(x_ref, w_ref, b_ref, o_ref):
    """Fused 6-layer MLP for one (TB, 8) batch tile.

    x_ref: (TB, 8)       input states, lanes 7.. are zero.
    w_ref: (6, 64, 64)   zero-padded weights (in, out) per layer.
    b_ref: (6, 1, 64)    zero-padded biases.
    o_ref: (TB, 8)       first 4 lanes are the real Q-values.

    Zero padding is self-consistent: padded lanes stay exactly 0 through every
    layer, so lanes [:ACTION_SIZE] of the output equal the unpadded network.
    """
    # Layer 0: (TB, 8) @ (8, 64)  — only the first IN_PAD weight rows are used.
    w0 = w_ref[0]
    h = jnp.dot(x_ref[...], w0[:IN_PAD, :],
                preferred_element_type=jnp.float32) + b_ref[0]
    h = jnp.maximum(h, 0.0)

    # Hidden layers 1..4 (ReLU), all (TB, 64) @ (64, 64).
    for layer in range(1, NUM_LAYERS - 1):
        h = jnp.maximum(
            jnp.dot(h, w_ref[layer],
                    preferred_element_type=jnp.float32) + b_ref[layer],
            0.0)

    # Output layer (no ReLU); store only the first OUT_PAD lanes.
    y = jnp.dot(h, w_ref[NUM_LAYERS - 1],
                preferred_element_type=jnp.float32) + b_ref[NUM_LAYERS - 1]
    o_ref[...] = y[:, :OUT_PAD].astype(o_ref.dtype)


def pack_params(params):
    """Pack per-layer (W (in,out), b (1,out)) into two 64-wide f32 slabs."""
    w_slab = jnp.zeros((NUM_LAYERS, FEAT, FEAT), jnp.float32)
    b_slab = jnp.zeros((NUM_LAYERS, 1, FEAT), jnp.float32)
    for l, (w, b) in enumerate(params):
        fi, fo = w.shape
        w_slab = w_slab.at[l, :fi, :fo].set(w)
        b_slab = b_slab.at[l, 0, :fo].set(b.reshape(-1))
    return w_slab, b_slab


def dqn_forward(x, w_slab, b_slab, *, block_b=512):
    """x: (B, STATE_SIZE) f32. Returns (B, ACTION_SIZE) Q-values."""
    B = x.shape[0]
    B8 = _round_up(B, 8)                        # sublane-align the batch (cheap)
    # At least two tiles for B >= 16 so both v7x TensorCores get work.
    TB = min(block_b, _round_up(pl.cdiv(B8, 2), 8))
    # Only pad: 7 -> 8 lanes, rows -> multiple of 8 (32 B/row total).
    x_pad = jnp.zeros((B8, IN_PAD), jnp.float32).at[:B, :STATE_SIZE].set(x)

    grid = (pl.cdiv(B8, TB),)                   # ragged last block handled by Pallas
    out = pl.pallas_call(
        dqn_kernel,
        out_shape=jax.ShapeDtypeStruct((B8, OUT_PAD), jnp.float32),
        grid_spec=pltpu.PrefetchScalarGridSpec(
            num_scalar_prefetch=0,
            grid=grid,
            in_specs=[
                # batch tile of states (lane-narrow: 32 B/row)
                pl.BlockSpec((TB, IN_PAD), lambda i: (i, 0)),
                # packed params: constant block index -> single DMA, VMEM-resident;
                # Buffered(1) drops the useless second buffer.
                pl.BlockSpec((NUM_LAYERS, FEAT, FEAT), lambda i: (0, 0, 0),
                             pipeline_mode=pl.Buffered(1)),
                pl.BlockSpec((NUM_LAYERS, 1, FEAT), lambda i: (0, 0, 0),
                             pipeline_mode=pl.Buffered(1)),
            ],
            out_specs=pl.BlockSpec((TB, OUT_PAD), lambda i: (i, 0)),
        ),
        compiler_params=pltpu.CompilerParams(
            dimension_semantics=("parallel",)),   # shard batch tiles across TCs
    )(x_pad, w_slab, b_slab)
    return out[:B, :ACTION_SIZE]


def init_params(key):
    """PyTorch nn.Linear default init: W, b ~ U(-1/sqrt(fan_in), 1/sqrt(fan_in)).
    Weights stored as (in, out) so the kernel computes x @ W + b."""
    params = []
    for i in range(NUM_LAYERS):
        fan_in, fan_out = LAYER_SIZES[i], LAYER_SIZES[i + 1]
        key, kw, kb = jax.random.split(key, 3)
        bound = 1.0 / jnp.sqrt(jnp.float32(fan_in))
        w = jax.random.uniform(kw, (fan_in, fan_out), jnp.float32, -bound, bound)
        b = jax.random.uniform(kb, (1, fan_out), jnp.float32, -bound, bound)
        params.append((w, b))
    return params


def reference_forward(x, params):
    h = x
    for (w, b) in params[:-1]:
        h = jnp.maximum(
            jnp.dot(h, w, precision=jax.lax.Precision.HIGHEST) + b, 0.0)
    w, b = params[-1]
    return jnp.dot(h, w, precision=jax.lax.Precision.HIGHEST) + b


if __name__ == "__main__":
    key = jax.random.PRNGKey(0)
    key, kx = jax.random.split(key)

    params = init_params(key)
    w_slab, b_slab = pack_params(params)

    # B=8:   single tile.
    # B=20:  two tiles + ragged last block (exercises cdiv grid).
    # B=512: two 256-row tiles on the parallel batch axis.
    for B in (8, 20, 512):
        key, kx = jax.random.split(key)
        x = jax.random.uniform(kx, (B, STATE_SIZE), jnp.float32, 0.0, 100.0)
        out = jax.block_until_ready(dqn_forward(x, w_slab, b_slab))
        ref = reference_forward(x, params)
        assert out.shape == (B, ACTION_SIZE)
        assert jnp.allclose(out, ref, atol=2e-3, rtol=5e-4), f"mismatch (B={B})"

    print("KERNEL_OK")
</pallas_src>

<mosaic_0001>
module attributes {stable_mosaic.version = 11 : i64} {
  func.func @dqn_kernel(%arg0: i32, %arg1: memref<8x8xf32, #tpu.memory_space<vmem>>, %arg2: memref<6x64x64xf32, #tpu.memory_space<vmem>>, %arg3: memref<6x1x64xf32, #tpu.memory_space<vmem>>, %arg4: memref<8x8xf32, #tpu.memory_space<vmem>>) attributes {dimension_semantics = [#tpu.dimension_semantics<parallel>], iteration_bounds = array<i64: 1>, scalar_prefetch = 0 : i64, scratch_operands = 0 : i64, tpu.core_type = #tpu.core_type<tc>, window_params = [{transform_indices = @transform_0, window_bounds = array<i64: 8, 8>}, {pipeline_mode = #tpu.pipeline_mode<synchronous>, transform_indices = @transform_1, window_bounds = array<i64: 6, 64, 64>}, {pipeline_mode = #tpu.pipeline_mode<synchronous>, transform_indices = @transform_2, window_bounds = array<i64: 6, 1, 64>}, {transform_indices = @transform_3, window_bounds = array<i64: 8, 8>}]} {
    %c0 = arith.constant 0 : index
    %c0_0 = arith.constant 0 : index
    %c0_1 = arith.constant 0 : index
    %0 = vector.load %arg2[%c0, %c0_0, %c0_1] : memref<6x64x64xf32, #tpu.memory_space<vmem>>, vector<1x64x64xf32>
    %1 = vector.shape_cast %0 : vector<1x64x64xf32> to vector<64x64xf32>
    %c0_2 = arith.constant 0 : index
    %c0_3 = arith.constant 0 : index
    %2 = vector.load %arg1[%c0_2, %c0_3] : memref<8x8xf32, #tpu.memory_space<vmem>>, vector<8x8xf32>
    %3 = vector.extract_strided_slice %1 {offsets = [0, 0], sizes = [8, 64], strides = [1, 1]} : vector<64x64xf32> to vector<8x64xf32>
    %cst = arith.constant dense<0.000000e+00> : vector<8x64xf32>
    %4 = tpu.matmul %2, %3, %cst {dimension_numbers = #tpu.dot_dimension_numbers<[1], [0], [0], [1], [0, 0, 1, 1], [], []>} : vector<8x8xf32>, vector<8x64xf32>, vector<8x64xf32> -> vector<8x64xf32>
    %c0_4 = arith.constant 0 : index
    %c0_5 = arith.constant 0 : index
    %c0_6 = arith.constant 0 : index
    %5 = vector.load %arg3[%c0_4, %c0_5, %c0_6] : memref<6x1x64xf32, #tpu.memory_space<vmem>>, vector<1x1x64xf32>
    %6 = vector.shape_cast %5 : vector<1x1x64xf32> to vector<1x64xf32>
    %7 = vector.broadcast %6 : vector<1x64xf32> to vector<8x64xf32>
    %8 = arith.addf %4, %7 : vector<8x64xf32>
    %cst_7 = arith.constant 0.000000e+00 : f32
    %9 = vector.broadcast %cst_7 : f32 to vector<8x64xf32>
    %10 = arith.maximumf %8, %9 : vector<8x64xf32>
    %c1 = arith.constant 1 : index
    %c0_8 = arith.constant 0 : index
    %c0_9 = arith.constant 0 : index
    %11 = vector.load %arg2[%c1, %c0_8, %c0_9] : memref<6x64x64xf32, #tpu.memory_space<vmem>>, vector<1x64x64xf32>
    %12 = vector.shape_cast %11 : vector<1x64x64xf32> to vector<64x64xf32>
    %cst_10 = arith.constant dense<0.000000e+00> : vector<8x64xf32>
    %13 = tpu.matmul %10, %12, %cst_10 {dimension_numbers = #tpu.dot_dimension_numbers<[1], [0], [0], [1], [0, 0, 1, 1], [], []>} : vector<8x64xf32>, vector<64x64xf32>, vector<8x64xf32> -> vector<8x64xf32>
    %c1_11 = arith.constant 1 : index
    %c0_12 = arith.constant 0 : index
    %c0_13 = arith.constant 0 : index
    %14 = vector.load %arg3[%c1_11, %c0_12, %c0_13] : memref<6x1x64xf32, #tpu.memory_space<vmem>>, vector<1x1x64xf32>
    %15 = vector.shape_cast %14 : vector<1x1x64xf32> to vector<1x64xf32>
    %16 = vector.broadcast %15 : vector<1x64xf32> to vector<8x64xf32>
    %17 = arith.addf %13, %16 : vector<8x64xf32>
    %cst_14 = arith.constant 0.000000e+00 : f32
    %18 = vector.broadcast %cst_14 : f32 to vector<8x64xf32>
    %19 = arith.maximumf %17, %18 : vector<8x64xf32>
    %c2 = arith.constant 2 : index
    %c0_15 = arith.constant 0 : index
    %c0_16 = arith.constant 0 : index
    %20 = vector.load %arg2[%c2, %c0_15, %c0_16] : memref<6x64x64xf32, #tpu.memory_space<vmem>>, vector<1x64x64xf32>
    %21 = vector.shape_cast %20 : vector<1x64x64xf32> to vector<64x64xf32>
    %cst_17 = arith.constant dense<0.000000e+00> : vector<8x64xf32>
    %22 = tpu.matmul %19, %21, %cst_17 {dimension_numbers = #tpu.dot_dimension_numbers<[1], [0], [0], [1], [0, 0, 1, 1], [], []>} : vector<8x64xf32>, vector<64x64xf32>, vector<8x64xf32> -> vector<8x64xf32>
    %c2_18 = arith.constant 2 : index
    %c0_19 = arith.constant 0 : index
    %c0_20 = arith.constant 0 : index
    %23 = vector.load %arg3[%c2_18, %c0_19, %c0_20] : memref<6x1x64xf32, #tpu.memory_space<vmem>>, vector<1x1x64xf32>
    %24 = vector.shape_cast %23 : vector<1x1x64xf32> to vector<1x64xf32>
    %25 = vector.broadcast %24 : vector<1x64xf32> to vector<8x64xf32>
    %26 = arith.addf %22, %25 : vector<8x64xf32>
    %cst_21 = arith.constant 0.000000e+00 : f32
    %27 = vector.broadcast %cst_21 : f32 to vector<8x64xf32>
    %28 = arith.maximumf %26, %27 : vector<8x64xf32>
    %c3 = arith.constant 3 : index
    %c0_22 = arith.constant 0 : index
    %c0_23 = arith.constant 0 : index
    %29 = vector.load %arg2[%c3, %c0_22, %c0_23] : memref<6x64x64xf32, #tpu.memory_space<vmem>>, vector<1x64x64xf32>
    %30 = vector.shape_cast %29 : vector<1x64x64xf32> to vector<64x64xf32>
    %cst_24 = arith.constant dense<0.000000e+00> : vector<8x64xf32>
    %31 = tpu.matmul %28, %30, %cst_24 {dimension_numbers = #tpu.dot_dimension_numbers<[1], [0], [0], [1], [0, 0, 1, 1], [], []>} : vector<8x64xf32>, vector<64x64xf32>, vector<8x64xf32> -> vector<8x64xf32>
    %c3_25 = arith.constant 3 : index
    %c0_26 = arith.constant 0 : index
    %c0_27 = arith.constant 0 : index
    %32 = vector.load %arg3[%c3_25, %c0_26, %c0_27] : memref<6x1x64xf32, #tpu.memory_space<vmem>>, vector<1x1x64xf32>
    %33 = vector.shape_cast %32 : vector<1x1x64xf32> to vector<1x64xf32>
    %34 = vector.broadcast %33 : vector<1x64xf32> to vector<8x64xf32>
    %35 = arith.addf %31, %34 : vector<8x64xf32>
    %cst_28 = arith.constant 0.000000e+00 : f32
    %36 = vector.broadcast %cst_28 : f32 to vector<8x64xf32>
    %37 = arith.maximumf %35, %36 : vector<8x64xf32>
    %c4 = arith.constant 4 : index
    %c0_29 = arith.constant 0 : index
    %c0_30 = arith.constant 0 : index
    %38 = vector.load %arg2[%c4, %c0_29, %c0_30] : memref<6x64x64xf32, #tpu.memory_space<vmem>>, vector<1x64x64xf32>
    %39 = vector.shape_cast %38 : vector<1x64x64xf32> to vector<64x64xf32>
    %cst_31 = arith.constant dense<0.000000e+00> : vector<8x64xf32>
    %40 = tpu.matmul %37, %39, %cst_31 {dimension_numbers = #tpu.dot_dimension_numbers<[1], [0], [0], [1], [0, 0, 1, 1], [], []>} : vector<8x64xf32>, vector<64x64xf32>, vector<8x64xf32> -> vector<8x64xf32>
    %c4_32 = arith.constant 4 : index
    %c0_33 = arith.constant 0 : index
    %c0_34 = arith.constant 0 : index
    %41 = vector.load %arg3[%c4_32, %c0_33, %c0_34] : memref<6x1x64xf32, #tpu.memory_space<vmem>>, vector<1x1x64xf32>
    %42 = vector.shape_cast %41 : vector<1x1x64xf32> to vector<1x64xf32>
    %43 = vector.broadcast %42 : vector<1x64xf32> to vector<8x64xf32>
    %44 = arith.addf %40, %43 : vector<8x64xf32>
    %cst_35 = arith.constant 0.000000e+00 : f32
    %45 = vector.broadcast %cst_35 : f32 to vector<8x64xf32>
    %46 = arith.maximumf %44, %45 : vector<8x64xf32>
    %c5 = arith.constant 5 : index
    %c0_36 = arith.constant 0 : index
    %c0_37 = arith.constant 0 : index
    %47 = vector.load %arg2[%c5, %c0_36, %c0_37] : memref<6x64x64xf32, #tpu.memory_space<vmem>>, vector<1x64x64xf32>
    %48 = vector.shape_cast %47 : vector<1x64x64xf32> to vector<64x64xf32>
    %cst_38 = arith.constant dense<0.000000e+00> : vector<8x64xf32>
    %49 = tpu.matmul %46, %48, %cst_38 {dimension_numbers = #tpu.dot_dimension_numbers<[1], [0], [0], [1], [0, 0, 1, 1], [], []>} : vector<8x64xf32>, vector<64x64xf32>, vector<8x64xf32> -> vector<8x64xf32>
    %c5_39 = arith.constant 5 : index
    %c0_40 = arith.constant 0 : index
    %c0_41 = arith.constant 0 : index
    %50 = vector.load %arg3[%c5_39, %c0_40, %c0_41] : memref<6x1x64xf32, #tpu.memory_space<vmem>>, vector<1x1x64xf32>
    %51 = vector.shape_cast %50 : vector<1x1x64xf32> to vector<1x64xf32>
    %52 = vector.broadcast %51 : vector<1x64xf32> to vector<8x64xf32>
    %53 = arith.addf %49, %52 : vector<8x64xf32>
    %54 = vector.extract_strided_slice %53 {offsets = [0, 0], sizes = [8, 8], strides = [1, 1]} : vector<8x64xf32> to vector<8x8xf32>
    %c0_42 = arith.constant 0 : index
    %c0_43 = arith.constant 0 : index
    %55 = vector.load %arg4[%c0_42, %c0_43] : memref<8x8xf32, #tpu.memory_space<vmem>>, vector<8x8xf32>
    tpu.vector_store %arg4[%c0_42, %c0_43], %54 {strides = array<i32>} : memref<8x8xf32, #tpu.memory_space<vmem>>, vector<8x8xf32>,
    return
  }
  func.func @transform_0(%arg0: i32) -> (i32, i32) {
    %c0_i32 = arith.constant 0 : i32
    %c0_i32_0 = arith.constant 0 : i32
    return %arg0, %c0_i32 : i32, i32
  }
  func.func @transform_1(%arg0: i32) -> (i32, i32, i32) {
    %c0_i32 = arith.constant 0 : i32
    %c0_i32_0 = arith.constant 0 : i32
    %c0_i32_1 = arith.constant 0 : i32
    %c0_i32_2 = arith.constant 0 : i32
    return %c0_i32, %c0_i32_0, %c0_i32_1 : i32, i32, i32
  }
  func.func @transform_2(%arg0: i32) -> (i32, i32, i32) {
    %c0_i32 = arith.constant 0 : i32
    %c0_i32_0 = arith.constant 0 : i32
    %c0_i32_1 = arith.constant 0 : i32
    %c0_i32_2 = arith.constant 0 : i32
    return %c0_i32, %c0_i32_0, %c0_i32_1 : i32, i32, i32
  }
  func.func @transform_3(%arg0: i32) -> (i32, i32) {
    %c0_i32 = arith.constant 0 : i32
    %c0_i32_0 = arith.constant 0 : i32
    return %arg0, %c0_i32 : i32, i32
  }
}

</mosaic_0001>

<bundles_post_ra>
// kernel: tpu_custom_call.1
= control target key start
LH: loop header
LB: loop body
LE: loop exit
PB: predicated region body
PF: predicated region fallthrough
CT: control target
= control target key end

     0   :  { %8 = vsyncpa [#allocation3], 0  ;;  %s967_s0 = inlined_call_operand.hbm [shape: f32[8,8], index: 0, kind: input, shape index: {}]   ;;  %s968_s1 = inlined_call_operand.hbm [shape: f32[6,64,64], index: 1, kind: input, shape index: {}]   ;;  %s969_s2 = inlined_call_operand.hbm [shape: f32[6,1,64], index: 2, kind: input, shape index: {}]   ;;  %s970_s3 = inlined_call_operand.hbm [shape: f32[8,8], index: 3, kind: output, shape index: {}]  }
   0x1   :  { %9 = vsyncpa [#allocation6], 0 }
   0x2   :  { %10 = vsyncpa [#allocation4], 0  ;;  %s865_s12 = smov [#allocation5]  }
   0x3   :  { %s26_s13 = sshll.u32 %s865_s12, 4  ;;  %s27_s13 = int_to_ptr.vmem [resolvable:$true] %s26_s13 }
   0x4   :  { %s787_s14 = scalar_lea.vmem %s27_s13, 6144  ;;  %p792_p1 = scmp.lt.s32.totalorder %s27_s13, %s27_s13 }
   0x5   :  { %p788_p0 = scmp.ne.s32.totalorder %s27_s13, %s787_s14  ;;  %p793_p2 = scmp.lt.s32.totalorder %s787_s14, %s787_s14 }
   0x7   :  { %p794_p3 = por %p793_p2, %p792_p1 }
   0x9   :  { %p795_p4 = pnand %p794_p3, %p788_p0 }
   0xb   :  { %798 = shalt.err (!%p795_p4)
}
   0xc   :  { %s866_s15 = smov 128   ;;  %s867_s16 = smov 8  }
   0xd   :  { %32 = dma.hbm_to_vmem [thread:$0]  %s968_s1, 6144, %s27_s13, [#allocation6], %s866_s15, %s866_s15, %s867_s16  }
   0xe   :  { %s868_s19 = smov [#allocation2]   ;;  %s869_s21 = smov [#allocation7]  }
   0xf   :  { %s17_s20 = sshll.u32 %s868_s19, 4  ;;  %s38_s22 = sshll.u32 %s869_s21, 4  ;;  %s18_s20 = int_to_ptr.vmem [resolvable:$true] %s17_s20  ;;  %s39_s22 = int_to_ptr.vmem [resolvable:$true] %s38_s22 }
  0x10   :  { %s807_s23 = scalar_lea.vmem %s18_s20, 128  ;;  %p812_p6 = scmp.lt.s32.totalorder %s18_s20, %s18_s20 }
  0x11   :  { %p808_p5 = scmp.ne.s32.totalorder %s18_s20, %s807_s23  ;;  %p813_p7 = scmp.lt.s32.totalorder %s807_s23, %s807_s23 }
  0x13   :  { %p814_p8 = por %p813_p7, %p812_p6 }
  0x15   :  { %p815_p9 = pnand %p814_p8, %p808_p5 }
  0x17   :  { %818 = shalt.err (!%p815_p9)
}
  0x18   :  { %20 = dma.hbm_to_vmem [thread:$0]  %s967_s0, 128, %s18_s20, [#allocation3]  }
  0x19   :  { %s827_s26 = scalar_lea.vmem %s39_s22, 96  ;;  %p832_p11 = scmp.lt.s32.totalorder %s39_s22, %s39_s22 }
  0x1a   :  { %p828_p10 = scmp.ne.s32.totalorder %s39_s22, %s827_s26  ;;  %p833_p12 = scmp.lt.s32.totalorder %s827_s26, %s827_s26 }
  0x1c   :  { %p834_p13 = por %p833_p12, %p832_p11 }
  0x1e   :  { %p835_p0 = pnand %p834_p13, %p828_p10 }
  0x20   :  { %838 = shalt.err (!%p835_p0)
}
  0x21   :  { %s870_s1 = smov 16   ;;  %s871_s27 = smov 1  }
  0x22   :  { %44 = dma.hbm_to_vmem [thread:$0]  %s969_s2, 96, %s39_s22, [#allocation6], %s870_s1, %s870_s1, %s871_s27  }
  0x23   :  { %859 = dma.done.wait [#allocation3], 128  }
  0x24   :  { %860 = vsyncadd [#allocation3], 4294967168 }
  0x25   :  { %861 = dma.done.wait [#allocation6], 6240  }
  0x26   :  { %862 = vsyncadd [#allocation6], 4294961056  ;;  %v872_v0 = vmov 0.0   ;;  %vm873_vm0 = vmmov 0   ;;  %vm63_vm1 = vcmask 64512   ;;  %v54_v1 = vld [vmem:[#allocation5] sm:$0xff] }
  0x27   :  { %669 = vmatprep.subr.mxu0 %v872_v0  ;;  %671 = vmatprep.mubr.msk.f32.mxu0 %vm873_vm0, %v872_v0  ;;  %v55_v2 = vld [vmem:[#allocation2] sm:$0xff]  ;;  %v145_v4 = vld [vmem:[#allocation5 + $0x70] sm:$0xff]  ;;  %v144_v5 = vld [vmem:[#allocation5 + $0x68] sm:$0xff]  ;;  %vm155_vm2 = vcmask 523264   ;;  %s874_s0 = smov [#allocation8]  }
  0x28   :  { %674 = vmatprep.subr.mxu1 %v872_v0  ;;  %690 = vmatprep.mubr.msk.f32.mxu1 %vm873_vm0, %v872_v0  ;;  %v146_v3 = vld [vmem:[#allocation5 + $0x78] sm:$0xff]  ;;  %v143_v6 = vld [vmem:[#allocation5 + $0x60] sm:$0xff]  ;;  %v141_v8 = vld [vmem:[#allocation5 + $0x50] sm:$0xff]  ;;  %s600_s2 = sshll.u32 %s874_s0, 4  ;;  %s601_s2 = int_to_ptr.vmem [resolvable:$true] %s600_s2 }
  0x29   :  { %670 = vmatpush3.msra.mxu0 %v54_v1  ;;  %675 = vmatpush3.msra.mxu1 %v146_v3  ;;  %v142_v7 = vld [vmem:[#allocation5 + $0x58] sm:$0xff]  ;;  %v140_v9 = vld [vmem:[#allocation5 + $0x48] sm:$0xff]  ;;  %v139_v10 = vld [vmem:[#allocation5 + $0x40] sm:$0xff]  ;;  %s839_s30 = scalar_lea.vmem %s601_s2, 128  ;;  %p844_p2 = scmp.lt.s32.totalorder %s601_s2, %s601_s2 }
  0x2a   :  { %672 = vmatmul.mubr.msk.f32.vlgmr.msra.gmra.mxu0 %vm63_vm1, %v55_v2  ;;  %676 = vmatprep.subr.mxu1 %v872_v0  ;;  %v238_v11 = vld [vmem:[#allocation5 + $0xb8] sm:$0xff]  ;;  %v237_v12 = vld [vmem:[#allocation5 + $0xb0] sm:$0xff]  ;;  %v236_v13 = vld [vmem:[#allocation5 + $0xa8] sm:$0xff]  ;;  %p840_p1 = scmp.ne.s32.totalorder %s601_s2, %s839_s30  ;;  %p845_p3 = scmp.lt.s32.totalorder %s839_s30, %s839_s30 }
  0x2b   :  { %677 = vmatpush3.msra.mxu1 %v145_v4  ;;  %693 = vmatprep.subr.mxu0 %v872_v0  ;;  %v235_v14 = vld [vmem:[#allocation5 + $0xa0] sm:$0xff]  ;;  %v234_v15 = vld [vmem:[#allocation5 + $0x98] sm:$0xff]  ;;  %v233_v21 = vld [vmem:[#allocation5 + $0x90] sm:$0xff] }
  0x2c   :  { %678 = vmatprep.subr.mxu1 %v872_v0  ;;  %709 = vmatprep.mubr.msk.f32.mxu0 %vm873_vm0, %v872_v0  ;;  %v610_v16 = vld [vmem:[#allocation7] ss:$0 sm:$0xff]  ;;  %v232_v22 = vld [vmem:[#allocation5 + $0x88] sm:$0xff]  ;;  %v329_v24 = vld [vmem:[#allocation5 + $0xf8] sm:$0xff]  ;;  %p846_p4 = por %p845_p3, %p844_p2 }
  0x2d   :  { %679 = vmatpush3.msra.mxu1 %v144_v5  ;;  %694 = vmatpush3.msra.mxu0 %v238_v11  ;;  %v231_v23 = vld [vmem:[#allocation5 + $0x80] sm:$0xff]  ;;  %v328_v25 = vld [vmem:[#allocation5 + $0xf0] sm:$0xff]  ;;  %v327_v26 = vld [vmem:[#allocation5 + $0xe8] sm:$0xff] }
  0x2e   :  { %680 = vmatprep.subr.mxu1 %v872_v0  ;;  %695 = vmatprep.subr.mxu0 %v872_v0  ;;  %v326_v27 = vld [vmem:[#allocation5 + $0xe0] sm:$0xff]  ;;  %v325_v28 = vld [vmem:[#allocation5 + $0xd8] sm:$0xff]  ;;  %v324_v34 = vld [vmem:[#allocation5 + $0xd0] sm:$0xff]  ;;  %p847_p5 = pnand %p846_p4, %p840_p1 }
  0x2f   :  { %681 = vmatpush3.msra.mxu1 %v143_v6  ;;  %696 = vmatpush3.msra.mxu0 %v237_v12  ;;  %v612_v29 = vld [vmem:[#allocation7 + $0x1] ss:$0 sm:$0xff]  ;;  %v323_v35 = vld [vmem:[#allocation5 + $0xc8] sm:$0xff]  ;;  %v420_v37 = vld [vmem:[#allocation5 + $0x138] sm:$0xff] }
  0x30   :  { %682 = vmatprep.subr.mxu1 %v872_v0  ;;  %697 = vmatprep.subr.mxu0 %v872_v0  ;;  %v322_v36 = vld [vmem:[#allocation5 + $0xc0] sm:$0xff]  ;;  %v419_v38 = vld [vmem:[#allocation5 + $0x130] sm:$0xff]  ;;  %v418_v39 = vld [vmem:[#allocation5 + $0x128] sm:$0xff] }
  0x31   :  { %683 = vmatpush3.msra.mxu1 %v142_v7  ;;  %698 = vmatpush3.msra.mxu0 %v236_v13  ;;  %v417_v40 = vld [vmem:[#allocation5 + $0x120] sm:$0xff]  ;;  %v416_v41 = vld [vmem:[#allocation5 + $0x118] sm:$0xff]  ;;  %v415_v47 = vld [vmem:[#allocation5 + $0x110] sm:$0xff] }
  0x32   :  { %684 = vmatprep.subr.mxu1 %v872_v0  ;;  %699 = vmatprep.subr.mxu0 %v872_v0  ;;  %v614_v42 = vld [vmem:[#allocation7 + $0x2] ss:$0 sm:$0xff]  ;;  %v414_v48 = vld [vmem:[#allocation5 + $0x108] sm:$0xff]  ;;  %v511_v50 = vld [vmem:[#allocation5 + $0x178] sm:$0xff] }
  0x33   :  { %685 = vmatpush3.msra.mxu1 %v141_v8  ;;  %700 = vmatpush3.msra.mxu0 %v235_v14  ;;  %v413_v49 = vld [vmem:[#allocation5 + $0x100] sm:$0xff]  ;;  %v510_v51 = vld [vmem:[#allocation5 + $0x170] sm:$0xff]  ;;  %v509_v52 = vld [vmem:[#allocation5 + $0x168] sm:$0xff] }
  0x34   :  { %686 = vmatprep.subr.mxu1 %v872_v0  ;;  %701 = vmatprep.subr.mxu0 %v872_v0  ;;  %v508_v53 = vld [vmem:[#allocation5 + $0x160] sm:$0xff]  ;;  %v507_v54 = vld [vmem:[#allocation5 + $0x158] sm:$0xff]  ;;  %v506_v60 = vld [vmem:[#allocation5 + $0x150] sm:$0xff] }
  0x35   :  { %687 = vmatpush3.msra.mxu1 %v140_v9  ;;  %702 = vmatpush3.msra.mxu0 %v234_v15  ;;  %v616_v55 = vld [vmem:[#allocation7 + $0x3] ss:$0 sm:$0xff]  ;;  %v505_v61 = vld [vmem:[#allocation5 + $0x148] sm:$0xff]  ;;  %v618_v63 = vld [vmem:[#allocation7 + $0x4] ss:$0 sm:$0xff] }
  0x36   :  { %688 = vmatprep.subr.mxu1 %v872_v0  ;;  %703 = vmatprep.subr.mxu0 %v872_v0  ;;  %v504_v62 = vld [vmem:[#allocation5 + $0x140] sm:$0xff] }
  0x37   :  { %689 = vmatpush3.msra.mxu1 %v139_v10  ;;  %704 = vmatpush3.msra.mxu0 %v233_v21  ;;  %v620_v5 = vld [vmem:[#allocation7 + $0x5] ss:$0 sm:$0xff] }
  0x38   :  { %712 = vmatprep.subr.mxu1 %v872_v0  ;;  %705 = vmatprep.subr.mxu0 %v872_v0 }
  0x39   :  { %706 = vmatpush3.msra.mxu0 %v232_v22 }
  0x3a   :  { %707 = vmatprep.subr.mxu0 %v872_v0 }
  0x3b   :  { %708 = vmatpush3.msra.mxu0 %v231_v23 }
  0x3c   :  { %731 = vmatprep.subr.mxu0 %v872_v0 }
  0xea   :  { %v133_v17 = vpop.f32.mrf.mxu0 }
  0xeb   :  { %v134_v18 = vadd.f32 %v610_v16, %v133_v17 }
  0xec   :  { %v673_v19 = vpop.f32.mrf.mxu0 }
  0xed   :  { %v137_v20 = vmax.f32 %v134_v18, 0.0 }
  0xef   :  { %691 = vmatmul.mubr.msk.f32.vlgmr.msra.gmra.mxu1 %vm155_vm2, %v137_v20 }
  0xf0   :  { %728 = vmatprep.mubr.msk.f32.mxu1 %vm873_vm0, %v872_v0  ;;  %713 = vmatpush3.msra.mxu1 %v329_v24 }
  0xf1   :  { %714 = vmatprep.subr.mxu1 %v872_v0 }
  0xf2   :  { %715 = vmatpush3.msra.mxu1 %v328_v25 }
  0xf3   :  { %716 = vmatprep.subr.mxu1 %v872_v0 }
  0xf4   :  { %717 = vmatpush3.msra.mxu1 %v327_v26 }
  0xf5   :  { %718 = vmatprep.subr.mxu1 %v872_v0 }
  0xf6   :  { %719 = vmatpush3.msra.mxu1 %v326_v27 }
  0xf7   :  { %720 = vmatprep.subr.mxu1 %v872_v0 }
  0xf8   :  { %721 = vmatpush3.msra.mxu1 %v325_v28 }
  0xf9   :  { %722 = vmatprep.subr.mxu1 %v872_v0 }
  0xfa   :  { %723 = vmatpush3.msra.mxu1 %v324_v34 }
  0xfb   :  { %724 = vmatprep.subr.mxu1 %v872_v0 }
  0xfc   :  { %725 = vmatpush3.msra.mxu1 %v323_v35 }
  0xfd   :  { %726 = vmatprep.subr.mxu1 %v872_v0 }
  0xfe   :  { %727 = vmatpush3.msra.mxu1 %v322_v36 }
  0xff   :  { %750 = vmatprep.subr.mxu1 %v872_v0 }
 0x1af   :  { %v225_v30 = vpop.f32.mrf.mxu1 }
 0x1b0   :  { %v226_v31 = vadd.f32 %v612_v29, %v225_v30 }
 0x1b1   :  { %v692_v32 = vpop.f32.mrf.mxu1 }
 0x1b2   :  { %v229_v33 = vmax.f32 %v226_v31, 0.0 }
 0x1b4   :  { %710 = vmatmul.mubr.msk.f32.vlgmr.msra.gmra.mxu0 %vm155_vm2, %v229_v33 }
 0x1b5   :  { %747 = vmatprep.mubr.msk.f32.mxu0 %vm873_vm0, %v872_v0  ;;  %732 = vmatpush3.msra.mxu0 %v420_v37 }
 0x1b6   :  { %733 = vmatprep.subr.mxu0 %v872_v0 }
 0x1b7   :  { %734 = vmatpush3.msra.mxu0 %v419_v38 }
 0x1b8   :  { %735 = vmatprep.subr.mxu0 %v872_v0 }
 0x1b9   :  { %736 = vmatpush3.msra.mxu0 %v418_v39 }
 0x1ba   :  { %737 = vmatprep.subr.mxu0 %v872_v0 }
 0x1bb   :  { %738 = vmatpush3.msra.mxu0 %v417_v40 }
 0x1bc   :  { %739 = vmatprep.subr.mxu0 %v872_v0 }
 0x1bd   :  { %740 = vmatpush3.msra.mxu0 %v416_v41 }
 0x1be   :  { %741 = vmatprep.subr.mxu0 %v872_v0 }
 0x1bf   :  { %742 = vmatpush3.msra.mxu0 %v415_v47 }
 0x1c0   :  { %743 = vmatprep.subr.mxu0 %v872_v0 }
 0x1c1   :  { %744 = vmatpush3.msra.mxu0 %v414_v48 }
 0x1c2   :  { %745 = vmatprep.subr.mxu0 %v872_v0 }
 0x1c3   :  { %746 = vmatpush3.msra.mxu0 %v413_v49 }
 0x274   :  { %v316_v43 = vpop.f32.mrf.mxu0 }
 0x275   :  { %v317_v44 = vadd.f32 %v614_v42, %v316_v43 }
 0x276   :  { %v711_v45 = vpop.f32.mrf.mxu0 }
 0x277   :  { %v320_v46 = vmax.f32 %v317_v44, 0.0 }
 0x279   :  { %729 = vmatmul.mubr.msk.f32.vlgmr.msra.gmra.mxu1 %vm155_vm2, %v320_v46 }
 0x27a   :  { %766 = vmatprep.mubr.msk.f32.mxu1 %vm873_vm0, %v872_v0  ;;  %751 = vmatpush3.msra.mxu1 %v511_v50 }
 0x27b   :  { %752 = vmatprep.subr.mxu1 %v872_v0 }
 0x27c   :  { %753 = vmatpush3.msra.mxu1 %v510_v51 }
 0x27d   :  { %754 = vmatprep.subr.mxu1 %v872_v0 }
 0x27e   :  { %755 = vmatpush3.msra.mxu1 %v509_v52 }
 0x27f   :  { %756 = vmatprep.subr.mxu1 %v872_v0 }
 0x280   :  { %757 = vmatpush3.msra.mxu1 %v508_v53 }
 0x281   :  { %758 = vmatprep.subr.mxu1 %v872_v0 }
 0x282   :  { %759 = vmatpush3.msra.mxu1 %v507_v54 }
 0x283   :  { %760 = vmatprep.subr.mxu1 %v872_v0 }
 0x284   :  { %761 = vmatpush3.msra.mxu1 %v506_v60 }
 0x285   :  { %762 = vmatprep.subr.mxu1 %v872_v0 }
 0x286   :  { %763 = vmatpush3.msra.mxu1 %v505_v61 }
 0x287   :  { %764 = vmatprep.subr.mxu1 %v872_v0 }
 0x288   :  { %765 = vmatpush3.msra.mxu1 %v504_v62 }
 0x339   :  { %v407_v56 = vpop.f32.mrf.mxu1 }
 0x33a   :  { %v408_v57 = vadd.f32 %v616_v55, %v407_v56 }
 0x33b   :  { %v730_v58 = vpop.f32.mrf.mxu1 }
 0x33c   :  { %v411_v59 = vmax.f32 %v408_v57, 0.0 }
 0x33e   :  { %748 = vmatmul.mubr.msk.f32.vlgmr.msra.gmra.mxu0 %vm155_vm2, %v411_v59 }
 0x3fe   :  { %v498_v1 = vpop.f32.mrf.mxu0 }
 0x3ff   :  { %v499_v2 = vadd.f32 %v618_v63, %v498_v1 }
 0x400   :  { %v749_v3 = vpop.f32.mrf.mxu0 }
 0x401   :  { %v502_v4 = vmax.f32 %v499_v2, 0.0 }
 0x403   :  { %767 = vmatmul.mubr.msk.f32.vlgmr.msra.gmra.mxu1 %vm155_vm2, %v502_v4 }
 0x4c3   :  { %v589_v6 = vpop.f32.mrf.mxu1 }
 0x4c4   :  { %v590_v7 = vadd.f32 %v620_v5, %v589_v6 }
 0x4c5   :  { %v768_v8 = vpop.f32.mrf.mxu1 }
 0x4c6   :  { %593 = vst.msk [vmem:[#allocation8] sm:$0xff] %vm63_vm1, %v590_v7 }
 0x4c7   :  { %850 = shalt.err (!%p847_p5)
}
 0x4c8   :  { %603 = dma.vmem_to_hbm [thread:$0]  %s601_s2, 128, %s970_s3, [#allocation4]  }
 0x4c9   :  { %863 = dma.done.wait [#allocation4], 128  }
 0x4ca   :  { %864 = vsyncadd [#allocation4], 4294967168 }
 0x4cb   :  { %607 = vsyncpa [#allocation3], 1 }
 0x4cc   :  { %608 = vsyncpa [#allocation6], 1 }
 0x4cd   :  { %609 = vsyncpa [#allocation4], 1 }

</bundles_post_ra>
